<compile_context>
chip_gen: v6e
topology: v6e:2x2x1
jax: 0.10.0
libtpu: 0.0.40
codegen_flags: <defaults>
</compile_context>

<pallas_src>
import functools
import math

import jax
import jax.numpy as jnp
from jax import lax
from jax.experimental import pallas as pl
from jax.experimental.pallas import tpu as pltpu


_NEG = -1e30  # finite "minus infinity" for masked (padded) logit columns


def _nt_xent_kernel(z1q_ref, z2q_ref, z1k_ref, z2k_ref, out_ref,
                    m_v, l_v, m_t, l_t, pos_acc,
                    *, neg_w, batch, tq, tk, mask_cols):
    qi = pl.program_id(0)
    ki = pl.program_id(1)

    @pl.when(ki == 0)
    def _init():
        neg_inf = jnp.full((tq, 1), -jnp.inf, jnp.float32)
        zeros = jnp.zeros((tq, 1), jnp.float32)
        m_v[...] = neg_inf
        l_v[...] = zeros
        m_t[...] = neg_inf
        l_t[...] = zeros
        pos_acc[...] = zeros

    z1q = z1q_ref[...]            # (tq, Dp) native dtype (bf16 stays bf16)
    z2q = z2q_ref[...]            # (tq, Dp)
    z1k = z1k_ref[...]            # (tk, Dp)
    z2k = z2k_ref[...]            # (tk, Dp)

    # Contract dim 1 of both operands == A @ B.T without materializing B.T.
    dn = (((1,), (1,)), ((), ()))
    neg_w_f = jnp.float32(neg_w)

    # Scalar (SMEM) tile tests from program ids only.
    q_lo = qi * tq
    k_lo = ki * tk
    has_diag = jnp.logical_and(q_lo < k_lo + tk, k_lo < q_lo + tq)
    needs_col_mask = (k_lo + tk) > batch   # tile contains a padded column

    def _diag_fix(cross, intra, capture_pos):
        # Only traced/executed on tiles that intersect the diagonal.
        row_g = q_lo + lax.broadcasted_iota(jnp.int32, (tq, tk), 0)
        col_g = k_lo + lax.broadcasted_iota(jnp.int32, (tq, tk), 1)
        diag = row_g == col_g
        if capture_pos:
            # positive logit = diagonal of the cross tile (already /T via the
            # wrapper pre-scale); captured BEFORE the padded-column mask.
            pos = jnp.sum(jnp.where(diag, cross, 0.0), axis=1, keepdims=True)
        else:
            pos = jnp.zeros((tq, 1), jnp.float32)
        # intra-modal self-similarity is zeroed (not -inf), as in torch.
        return jnp.where(diag, 0.0, intra), pos

    def _masked_cols(cross, intra):
        col_ok = (k_lo + lax.broadcasted_iota(jnp.int32, (tq, tk), 1)) < batch
        return jnp.where(col_ok, cross, _NEG), jnp.where(col_ok, intra, _NEG)

    def _unmasked(cross, intra):
        return cross, intra

    def _online(m_ref, l_ref, cross, intra):
        tile_max = jnp.maximum(jnp.max(cross, axis=1, keepdims=True),
                               jnp.max(intra, axis=1, keepdims=True))
        m_new = jnp.maximum(m_ref[...], tile_max)
        alpha = jnp.exp(m_ref[...] - m_new)
        part = (jnp.sum(jnp.exp(cross - m_new), axis=1, keepdims=True)
                + jnp.sum(jnp.exp(intra - m_new), axis=1, keepdims=True))
        l_ref[...] = alpha * l_ref[...] + part
        m_ref[...] = m_new

    # ---- vid path (rows = z1 q-tile); consumed before txt path starts ----
    cross_v = lax.dot_general(z1q, z2k, dn, preferred_element_type=jnp.float32)
    intra_v = lax.dot_general(z1q, z1k, dn,
                              preferred_element_type=jnp.float32) * neg_w_f
    intra_v, pos_v = lax.cond(
        has_diag,
        lambda c, i: _diag_fix(c, i, True),
        lambda c, i: (i, jnp.zeros((tq, 1), jnp.float32)),
        cross_v, intra_v)
    pos_acc[...] += pos_v          # zeros on non-diag tiles; (tq,1) add is tiny
    if mask_cols:                  # static: only traced when padding exists
        cross_v, intra_v = lax.cond(needs_col_mask, _masked_cols, _unmasked,
                                    cross_v, intra_v)
    _online(m_v, l_v, cross_v, intra_v)

    # ---- txt path (rows = z2 q-tile) ----
    cross_t = lax.dot_general(z2q, z1k, dn, preferred_element_type=jnp.float32)
    intra_t = lax.dot_general(z2q, z2k, dn,
                              preferred_element_type=jnp.float32) * neg_w_f
    intra_t = lax.cond(
        has_diag,
        lambda c, i: _diag_fix(c, i, False)[0],
        lambda c, i: i,
        cross_t, intra_t)
    if mask_cols:
        cross_t, intra_t = lax.cond(needs_col_mask, _masked_cols, _unmasked,
                                    cross_t, intra_t)
    _online(m_t, l_t, cross_t, intra_t)

    # ---- finalize: per-row (loss_i + loss_t), written once per q tile ----
    @pl.when(ki == pl.num_programs(1) - 1)
    def _finalize():
        lse_v = m_v[...] + jnp.log(l_v[...])
        lse_t = m_t[...] + jnp.log(l_t[...])
        # pos_i == pos_t == (z1_i . z2_i)/T, captured once on the diag tiles.
        out_ref[...] = (lse_v + lse_t - 2.0 * pos_acc[...]).astype(out_ref.dtype)
        # TODO(synk): lane-dense (1, block_q) output layout would avoid masked
        # vst.msk stores; output is tiny so kept as (block_q, 1) for safety.


def _round_up(x, m):
    return ((x + m - 1) // m) * m


def _sublane(dtype):
    # f32 -> 8, bf16/f16 -> 16, int8/fp8 -> 32 (packed sublane granularity)
    return max(8, 32 // jnp.dtype(dtype).itemsize)


def sample_nt_xent(z1, z2, temperature=0.03, negative_weight=0.8,
                   block_q=None, block_k=None, matmul_dtype=None):
    """Pallas TPU implementation of SampleNT_Xent.forward(z1, z2) -> scalar.

    matmul_dtype: optional numerics trade-off; e.g. jnp.bfloat16 casts f32
    inputs to bf16 MXU operands (accumulation stays f32).
    """
    assert z1.ndim == 2 and z1.shape == z2.shape
    B, D = z1.shape
    op_dtype = jnp.dtype(matmul_dtype) if matmul_dtype is not None else jnp.dtype(z1.dtype)
    g = _sublane(op_dtype)
    Dp = _round_up(D, 128)
    itemsize = op_dtype.itemsize

    def _pick(blk):
        cap = _round_up(B, g)
        if blk is None:
            # VMEM-budget-aware default: double-buffered q+k operand tiles
            # (4 x blk x Dp) plus ~3 f32 score tiles must fit a v7x-safe
            # (~40 MiB of the 64 MiB physical) working set.
            budget = 40 << 20
            blk = 128
            for cand in (512, 256, 128):
                foot = 2 * 4 * cand * Dp * itemsize + 3 * cand * cand * 4
                if foot <= budget:
                    blk = cand
                    break
        blk = min(blk, cap)
        return max(g, _round_up(blk, g))

    block_q = _pick(block_q)
    block_k = _pick(block_k)
    # Force block_k | block_q so batch padding never exceeds one q tile and no
    # grid step is entirely padding.
    if block_q % block_k != 0:
        block_k = max(g, math.gcd(block_q, block_k))

    Bp = _round_up(B, block_q)

    # Fold 1/temperature into the embeddings once: O(B*D) instead of O(Bp^2)
    # per-tile scale passes in the kernel (both cross and intra pick up 1/T).
    scale = math.sqrt(1.0 / float(temperature))
    z1s = (z1.astype(jnp.float32) * scale).astype(op_dtype)
    z2s = (z2.astype(jnp.float32) * scale).astype(op_dtype)
    z1p = jnp.pad(z1s, ((0, Bp - B), (0, Dp - D)))
    z2p = jnp.pad(z2s, ((0, Bp - B), (0, Dp - D)))

    kernel = functools.partial(
        _nt_xent_kernel,
        neg_w=float(negative_weight),
        batch=B, tq=block_q, tk=block_k,
        mask_cols=(Bp != B))

    grid = (Bp // block_q, Bp // block_k)   # (q tiles, k tiles); k = reduction

    # Explicit scoped-VMEM limit: sized to the double-buffered operand tiles
    # plus f32 intermediates, capped to stay inside v7x's 64 MiB physical VMEM.
    vmem_need = (2 * 2 * (block_q + block_k) * Dp * itemsize
                 + 4 * block_q * block_k * 4
                 + 16 * block_q * 4)
    vmem_limit = int(min(max(2 * vmem_need, 32 << 20), 48 << 20))

    per_row = pl.pallas_call(
        kernel,
        out_shape=jax.ShapeDtypeStruct((Bp, 1), jnp.float32),
        grid_spec=pltpu.PrefetchScalarGridSpec(
            num_scalar_prefetch=0,
            grid=grid,
            in_specs=[
                pl.BlockSpec((block_q, Dp), lambda qi, ki: (qi, 0)),  # z1 q-tile
                pl.BlockSpec((block_q, Dp), lambda qi, ki: (qi, 0)),  # z2 q-tile
                pl.BlockSpec((block_k, Dp), lambda qi, ki: (ki, 0)),  # z1 k-tile
                pl.BlockSpec((block_k, Dp), lambda qi, ki: (ki, 0)),  # z2 k-tile
            ],
            out_specs=pl.BlockSpec((block_q, 1), lambda qi, ki: (qi, 0)),
            scratch_shapes=[pltpu.VMEM((block_q, 1), jnp.float32)
                            for _ in range(5)],   # m_v, l_v, m_t, l_t, pos
        ),
        compiler_params=pltpu.CompilerParams(
            # TODO(synk): on v7x, pltpu.CORE_PARALLEL (or an explicit core_map)
            # on the q axis would guarantee 2-TensorCore sharding; kept as
            # "parallel" for portability across v5e/v6e/v7x.
            dimension_semantics=("parallel", "arbitrary"),
            vmem_limit_bytes=vmem_limit),
    )(z1p, z2p, z1p, z2p)

    # (loss_i.mean() + loss_t.mean()) / 2, dropping padded rows.
    return per_row[:B, 0].sum() / jnp.float32(2 * B)


def _reference(z1, z2, temperature=0.03, negative_weight=0.8):
    """Pure-JAX mirror of the PyTorch forward, for checking."""
    z1 = z1.astype(jnp.float32)
    z2 = z2.astype(jnp.float32)
    B = z1.shape[0]
    hp = jax.lax.Precision.HIGHEST
    lpv = jnp.matmul(z1, z2.T, precision=hp) / temperature
    lpt = jnp.matmul(z2, z1.T, precision=hp) / temperature
    lcv = jnp.matmul(z1, z1.T, precision=hp) / temperature
    lct = jnp.matmul(z2, z2.T, precision=hp) / temperature
    positive_mask = 1.0 - jnp.eye(B)
    vid_logits = jnp.concatenate([lpv, negative_weight * (lcv * positive_mask)], axis=1)
    txt_logits = jnp.concatenate([lpt, negative_weight * (lct * positive_mask)], axis=1)
    mask = jnp.concatenate([jnp.eye(B), jnp.zeros((B, B))], axis=1)
    loss_i = -jnp.log(jnp.sum(jax.nn.softmax(vid_logits, axis=1) * mask, axis=1))
    loss_t = -jnp.log(jnp.sum(jax.nn.softmax(txt_logits, axis=1) * mask, axis=1))
    return (loss_i.mean() + loss_t.mean()) / 2.0


if __name__ == "__main__":
    key = jax.random.PRNGKey(0)

    def make_inputs(k, B, D, dtype=jnp.float32):
        k1, k2 = jax.random.split(k)
        z1 = jax.random.normal(k1, (B, D), dtype=jnp.float32)
        z2 = jax.random.normal(k2, (B, D), dtype=jnp.float32)
        # Contrastive embeddings are L2-normalized in practice; this also keeps
        # the naive softmax reference finite at temperature=0.03.
        z1 = z1 / jnp.linalg.norm(z1, axis=-1, keepdims=True)
        z2 = z2 / jnp.linalg.norm(z2, axis=-1, keepdims=True)
        return z1.astype(dtype), z2.astype(dtype)

    # Unused-in-forward parameter from __init__, kept for parity.
    logit_scale = jnp.ones(())  # noqa: F841

    k0, k1, k2, k3 = jax.random.split(key, 4)

    # 1) multi-tile grid (4x4), aligned shapes (no padding path), f32 inputs;
    #    exercises the gated diagonal branch on off-diagonal tiles.
    z1, z2 = make_inputs(k0, 32, 128)
    got = sample_nt_xent(z1, z2, block_q=8, block_k=8)
    jax.block_until_ready(got)
    ref = _reference(z1, z2)
    assert jnp.allclose(got, ref, rtol=2e-2, atol=2e-2), (got, ref)

    # 2) ragged shapes + mismatched blocks -> wrapper pads B and D, kernel
    #    masks padded columns only on the last (padded) k tile.
    z1, z2 = make_inputs(k1, 30, 48)
    got = sample_nt_xent(z1, z2, block_q=16, block_k=8)
    jax.block_until_ready(got)
    ref = _reference(z1, z2)
    assert jnp.allclose(got, ref, rtol=2e-2, atol=2e-2), (got, ref)

    # 3) bf16 inputs hit the full-rate MXU path (f32 accumulation inside);
    #    tolerance accounts for the one extra bf16 rounding of the pre-scale.
    z1, z2 = make_inputs(k2, 32, 128, dtype=jnp.bfloat16)
    got = sample_nt_xent(z1, z2, block_q=16, block_k=16)
    jax.block_until_ready(got)
    ref = _reference(z1, z2)
    assert jnp.allclose(got, ref, rtol=2e-2, atol=2e-2), (got, ref)

    # 4) default (VMEM-aware) tile picker + opt-in bf16 matmul operands.
    z1, z2 = make_inputs(k3, 48, 64)
    got = sample_nt_xent(z1, z2, matmul_dtype=jnp.bfloat16)
    jax.block_until_ready(got)
    ref = _reference(z1, z2)
    assert jnp.allclose(got, ref, rtol=2e-2, atol=2e-2), (got, ref)

    print("KERNEL_OK")
</pallas_src>

<mosaic_0001>
module attributes {stable_mosaic.version = 11 : i64} {
  func.func @_nt_xent_kernel(%arg0: i32, %arg1: i32, %arg2: memref<8x128xf32, #tpu.memory_space<vmem>>, %arg3: memref<8x128xf32, #tpu.memory_space<vmem>>, %arg4: memref<8x128xf32, #tpu.memory_space<vmem>>, %arg5: memref<8x128xf32, #tpu.memory_space<vmem>>, %arg6: memref<8x1xf32, #tpu.memory_space<vmem>>, %arg7: memref<8x1xf32, #tpu.memory_space<vmem>>, %arg8: memref<8x1xf32, #tpu.memory_space<vmem>>, %arg9: memref<8x1xf32, #tpu.memory_space<vmem>>, %arg10: memref<8x1xf32, #tpu.memory_space<vmem>>, %arg11: memref<8x1xf32, #tpu.memory_space<vmem>>) attributes {dimension_semantics = [#tpu.dimension_semantics<parallel>, #tpu.dimension_semantics<arbitrary>], iteration_bounds = array<i64: 4, 4>, scalar_prefetch = 0 : i64, scratch_operands = 5 : i64, tpu.core_type = #tpu.core_type<tc>, window_params = [{transform_indices = @transform_0, window_bounds = array<i64: 8, 128>}, {transform_indices = @transform_1, window_bounds = array<i64: 8, 128>}, {transform_indices = @transform_2, window_bounds = array<i64: 8, 128>}, {transform_indices = @transform_3, window_bounds = array<i64: 8, 128>}, {transform_indices = @transform_4, window_bounds = array<i64: 8, 1>}]} {
    %c0_i32 = arith.constant 0 : i32
    %0 = arith.cmpi eq, %arg1, %c0_i32 : i32
    %1 = arith.extui %0 : i1 to i32
    %c0_i32_0 = arith.constant 0 : i32
    %2 = arith.cmpi ne, %1, %c0_i32_0 : i32
    scf.if %2 {
      %cst_51 = arith.constant 0xFF800000 : f32
      %86 = vector.broadcast %cst_51 : f32 to vector<8x1xf32>
      %cst_52 = arith.constant 0.000000e+00 : f32
      %87 = vector.broadcast %cst_52 : f32 to vector<8x1xf32>
      %c0_53 = arith.constant 0 : index
      %c0_54 = arith.constant 0 : index
      %88 = vector.load %arg7[%c0_53, %c0_54] : memref<8x1xf32, #tpu.memory_space<vmem>>, vector<8x1xf32>
      tpu.vector_store %arg7[%c0_53, %c0_54], %86 {strides = array<i32>} : memref<8x1xf32, #tpu.memory_space<vmem>>, vector<8x1xf32>,
      %c0_55 = arith.constant 0 : index
      %c0_56 = arith.constant 0 : index
      %89 = vector.load %arg8[%c0_55, %c0_56] : memref<8x1xf32, #tpu.memory_space<vmem>>, vector<8x1xf32>
      tpu.vector_store %arg8[%c0_55, %c0_56], %87 {strides = array<i32>} : memref<8x1xf32, #tpu.memory_space<vmem>>, vector<8x1xf32>,
      %c0_57 = arith.constant 0 : index
      %c0_58 = arith.constant 0 : index
      %90 = vector.load %arg9[%c0_57, %c0_58] : memref<8x1xf32, #tpu.memory_space<vmem>>, vector<8x1xf32>
      tpu.vector_store %arg9[%c0_57, %c0_58], %86 {strides = array<i32>} : memref<8x1xf32, #tpu.memory_space<vmem>>, vector<8x1xf32>,
      %c0_59 = arith.constant 0 : index
      %c0_60 = arith.constant 0 : index
      %91 = vector.load %arg10[%c0_59, %c0_60] : memref<8x1xf32, #tpu.memory_space<vmem>>, vector<8x1xf32>
      tpu.vector_store %arg10[%c0_59, %c0_60], %87 {strides = array<i32>} : memref<8x1xf32, #tpu.memory_space<vmem>>, vector<8x1xf32>,
      %c0_61 = arith.constant 0 : index
      %c0_62 = arith.constant 0 : index
      %92 = vector.load %arg11[%c0_61, %c0_62] : memref<8x1xf32, #tpu.memory_space<vmem>>, vector<8x1xf32>
      tpu.vector_store %arg11[%c0_61, %c0_62], %87 {strides = array<i32>} : memref<8x1xf32, #tpu.memory_space<vmem>>, vector<8x1xf32>,
    } else {
    }
    %c0 = arith.constant 0 : index
    %c0_1 = arith.constant 0 : index
    %3 = vector.load %arg2[%c0, %c0_1] : memref<8x128xf32, #tpu.memory_space<vmem>>, vector<8x128xf32>
    %c0_2 = arith.constant 0 : index
    %c0_3 = arith.constant 0 : index
    %4 = vector.load %arg3[%c0_2, %c0_3] : memref<8x128xf32, #tpu.memory_space<vmem>>, vector<8x128xf32>
    %c0_4 = arith.constant 0 : index
    %c0_5 = arith.constant 0 : index
    %5 = vector.load %arg4[%c0_4, %c0_5] : memref<8x128xf32, #tpu.memory_space<vmem>>, vector<8x128xf32>
    %c0_6 = arith.constant 0 : index
    %c0_7 = arith.constant 0 : index
    %6 = vector.load %arg5[%c0_6, %c0_7] : memref<8x128xf32, #tpu.memory_space<vmem>>, vector<8x128xf32>
    %c8_i32 = arith.constant 8 : i32
    %7 = arith.muli %arg0, %c8_i32 : i32
    %c8_i32_8 = arith.constant 8 : i32
    %8 = arith.muli %arg1, %c8_i32_8 : i32
    %c8_i32_9 = arith.constant 8 : i32
    %9 = arith.addi %8, %c8_i32_9 : i32
    %10 = arith.cmpi slt, %7, %9 : i32
    %c8_i32_10 = arith.constant 8 : i32
    %11 = arith.addi %7, %c8_i32_10 : i32
    %12 = arith.cmpi slt, %8, %11 : i32
    %13 = arith.andi %10, %12 : i1
    %cst = arith.constant dense<0.000000e+00> : vector<8x8xf32>
    %14 = tpu.matmul %3, %6, %cst {dimension_numbers = #tpu.dot_dimension_numbers<[1], [1], [0], [0], [0, 0, 1, 0], [], []>} : vector<8x128xf32>, vector<8x128xf32>, vector<8x8xf32> -> vector<8x8xf32>
    %cst_11 = arith.constant dense<0.000000e+00> : vector<8x8xf32>
    %15 = tpu.matmul %3, %5, %cst_11 {dimension_numbers = #tpu.dot_dimension_numbers<[1], [1], [0], [0], [0, 0, 1, 0], [], []>} : vector<8x128xf32>, vector<8x128xf32>, vector<8x8xf32> -> vector<8x8xf32>
    %cst_12 = arith.constant 8.000000e-01 : f32
    %16 = vector.broadcast %cst_12 : f32 to vector<8x8xf32>
    %17 = arith.mulf %15, %16 : vector<8x8xf32>
    %18 = arith.extui %13 : i1 to i32
    %c0_i32_13 = arith.constant 0 : i32
    %19 = arith.cmpi ne, %18, %c0_i32_13 : i32
    %20:2 = scf.if %19 -> (vector<8x8xf32>, vector<8x1xf32>) {
      %86 = tpu.iota {dimensions = array<i32: 0>} : vector<8x8xi32>
      %87 = vector.broadcast %7 : i32 to vector<8x8xi32>
      %88 = arith.addi %87, %86 : vector<8x8xi32>
      %89 = tpu.iota {dimensions = array<i32: 1>} : vector<8x8xi32>
      %90 = vector.broadcast %8 : i32 to vector<8x8xi32>
      %91 = arith.addi %90, %89 : vector<8x8xi32>
      %92 = arith.cmpi eq, %88, %91 : vector<8x8xi32>
      %cst_51 = arith.constant 0.000000e+00 : f32
      %93 = vector.broadcast %cst_51 : f32 to vector<8x8xf32>
      %94 = arith.select %92, %14, %93 : vector<8x8xi1>, vector<8x8xf32>
      %cst_52 = arith.constant dense<0.000000e+00> : vector<8xf32>
      %95 = vector.multi_reduction <add>, %94, %cst_52 [1] : vector<8x8xf32> to vector<8xf32>
      %96 = vector.shape_cast %95 : vector<8xf32> to vector<8x1xf32>
      %cst_53 = arith.constant 0.000000e+00 : f32
      %97 = vector.broadcast %cst_53 : f32 to vector<8x8xf32>
      %98 = arith.select %92, %97, %17 : vector<8x8xi1>, vector<8x8xf32>
      scf.yield %98, %96 : vector<8x8xf32>, vector<8x1xf32>
    } else {
      %cst_51 = arith.constant 0.000000e+00 : f32
      %86 = vector.broadcast %cst_51 : f32 to vector<8x1xf32>
      scf.yield %17, %86 : vector<8x8xf32>, vector<8x1xf32>
    }
    %c0_14 = arith.constant 0 : index
    %c0_15 = arith.constant 0 : index
    %21 = vector.load %arg11[%c0_14, %c0_15] : memref<8x1xf32, #tpu.memory_space<vmem>>, vector<8x1xf32>
    %22 = arith.addf %21, %20#1 : vector<8x1xf32>
    %c0_16 = arith.constant 0 : index
    %c0_17 = arith.constant 0 : index
    %23 = vector.load %arg11[%c0_16, %c0_17] : memref<8x1xf32, #tpu.memory_space<vmem>>, vector<8x1xf32>
    tpu.vector_store %arg11[%c0_16, %c0_17], %22 {strides = array<i32>} : memref<8x1xf32, #tpu.memory_space<vmem>>, vector<8x1xf32>,
    %cst_18 = arith.constant dense<0xFF800000> : vector<8xf32>
    %24 = vector.multi_reduction <maximumf>, %14, %cst_18 [1] : vector<8x8xf32> to vector<8xf32>
    %25 = vector.shape_cast %24 : vector<8xf32> to vector<8x1xf32>
    %cst_19 = arith.constant dense<0xFF800000> : vector<8xf32>
    %26 = vector.multi_reduction <maximumf>, %20#0, %cst_19 [1] : vector<8x8xf32> to vector<8xf32>
    %27 = vector.shape_cast %26 : vector<8xf32> to vector<8x1xf32>
    %28 = arith.maximumf %25, %27 : vector<8x1xf32>
    %c0_20 = arith.constant 0 : index
    %c0_21 = arith.constant 0 : index
    %29 = vector.load %arg7[%c0_20, %c0_21] : memref<8x1xf32, #tpu.memory_space<vmem>>, vector<8x1xf32>
    %30 = arith.maximumf %29, %28 : vector<8x1xf32>
    %c0_22 = arith.constant 0 : index
    %c0_23 = arith.constant 0 : index
    %31 = vector.load %arg7[%c0_22, %c0_23] : memref<8x1xf32, #tpu.memory_space<vmem>>, vector<8x1xf32>
    %32 = arith.subf %31, %30 : vector<8x1xf32>
    %33 = math.exp %32 : vector<8x1xf32>
    %34 = vector.broadcast %30 : vector<8x1xf32> to vector<8x8xf32>
    %35 = arith.subf %14, %34 : vector<8x8xf32>
    %36 = math.exp %35 : vector<8x8xf32>
    %cst_24 = arith.constant dense<0.000000e+00> : vector<8xf32>
    %37 = vector.multi_reduction <add>, %36, %cst_24 [1] : vector<8x8xf32> to vector<8xf32>
    %38 = vector.shape_cast %37 : vector<8xf32> to vector<8x1xf32>
    %39 = vector.broadcast %30 : vector<8x1xf32> to vector<8x8xf32>
    %40 = arith.subf %20#0, %39 : vector<8x8xf32>
    %41 = math.exp %40 : vector<8x8xf32>
    %cst_25 = arith.constant dense<0.000000e+00> : vector<8xf32>
    %42 = vector.multi_reduction <add>, %41, %cst_25 [1] : vector<8x8xf32> to vector<8xf32>
    %43 = vector.shape_cast %42 : vector<8xf32> to vector<8x1xf32>
    %44 = arith.addf %38, %43 : vector<8x1xf32>
    %c0_26 = arith.constant 0 : index
    %c0_27 = arith.constant 0 : index
    %45 = vector.load %arg8[%c0_26, %c0_27] : memref<8x1xf32, #tpu.memory_space<vmem>>, vector<8x1xf32>
    %46 = arith.mulf %33, %45 : vector<8x1xf32>
    %47 = arith.addf %46, %44 : vector<8x1xf32>
    %c0_28 = arith.constant 0 : index
    %c0_29 = arith.constant 0 : index
    %48 = vector.load %arg8[%c0_28, %c0_29] : memref<8x1xf32, #tpu.memory_space<vmem>>, vector<8x1xf32>
    tpu.vector_store %arg8[%c0_28, %c0_29], %47 {strides = array<i32>} : memref<8x1xf32, #tpu.memory_space<vmem>>, vector<8x1xf32>,
    %c0_30 = arith.constant 0 : index
    %c0_31 = arith.constant 0 : index
    %49 = vector.load %arg7[%c0_30, %c0_31] : memref<8x1xf32, #tpu.memory_space<vmem>>, vector<8x1xf32>
    tpu.vector_store %arg7[%c0_30, %c0_31], %30 {strides = array<i32>} : memref<8x1xf32, #tpu.memory_space<vmem>>, vector<8x1xf32>,
    %cst_32 = arith.constant dense<0.000000e+00> : vector<8x8xf32>
    %50 = tpu.matmul %4, %5, %cst_32 {dimension_numbers = #tpu.dot_dimension_numbers<[1], [1], [0], [0], [0, 0, 1, 0], [], []>} : vector<8x128xf32>, vector<8x128xf32>, vector<8x8xf32> -> vector<8x8xf32>
    %cst_33 = arith.constant dense<0.000000e+00> : vector<8x8xf32>
    %51 = tpu.matmul %4, %6, %cst_33 {dimension_numbers = #tpu.dot_dimension_numbers<[1], [1], [0], [0], [0, 0, 1, 0], [], []>} : vector<8x128xf32>, vector<8x128xf32>, vector<8x8xf32> -> vector<8x8xf32>
    %cst_34 = arith.constant 8.000000e-01 : f32
    %52 = vector.broadcast %cst_34 : f32 to vector<8x8xf32>
    %53 = arith.mulf %51, %52 : vector<8x8xf32>
    %54 = arith.extui %13 : i1 to i32
    %c0_i32_35 = arith.constant 0 : i32
    %55 = arith.cmpi ne, %54, %c0_i32_35 : i32
    %56 = scf.if %55 -> (vector<8x8xf32>) {
      %86 = tpu.iota {dimensions = array<i32: 0>} : vector<8x8xi32>
      %87 = vector.broadcast %7 : i32 to vector<8x8xi32>
      %88 = arith.addi %87, %86 : vector<8x8xi32>
      %89 = tpu.iota {dimensions = array<i32: 1>} : vector<8x8xi32>
      %90 = vector.broadcast %8 : i32 to vector<8x8xi32>
      %91 = arith.addi %90, %89 : vector<8x8xi32>
      %92 = arith.cmpi eq, %88, %91 : vector<8x8xi32>
      %cst_51 = arith.constant 0.000000e+00 : f32
      %93 = vector.broadcast %cst_51 : f32 to vector<8x8xf32>
      %94 = arith.select %92, %93, %53 : vector<8x8xi1>, vector<8x8xf32>
      scf.yield %94 : vector<8x8xf32>
    } else {
      scf.yield %53 : vector<8x8xf32>
    }
    %cst_36 = arith.constant dense<0xFF800000> : vector<8xf32>
    %57 = vector.multi_reduction <maximumf>, %50, %cst_36 [1] : vector<8x8xf32> to vector<8xf32>
    %58 = vector.shape_cast %57 : vector<8xf32> to vector<8x1xf32>
    %cst_37 = arith.constant dense<0xFF800000> : vector<8xf32>
    %59 = vector.multi_reduction <maximumf>, %56, %cst_37 [1] : vector<8x8xf32> to vector<8xf32>
    %60 = vector.shape_cast %59 : vector<8xf32> to vector<8x1xf32>
    %61 = arith.maximumf %58, %60 : vector<8x1xf32>
    %c0_38 = arith.constant 0 : index
    %c0_39 = arith.constant 0 : index
    %62 = vector.load %arg9[%c0_38, %c0_39] : memref<8x1xf32, #tpu.memory_space<vmem>>, vector<8x1xf32>
    %63 = arith.maximumf %62, %61 : vector<8x1xf32>
    %c0_40 = arith.constant 0 : index
    %c0_41 = arith.constant 0 : index
    %64 = vector.load %arg9[%c0_40, %c0_41] : memref<8x1xf32, #tpu.memory_space<vmem>>, vector<8x1xf32>
    %65 = arith.subf %64, %63 : vector<8x1xf32>
    %66 = math.exp %65 : vector<8x1xf32>
    %67 = vector.broadcast %63 : vector<8x1xf32> to vector<8x8xf32>
    %68 = arith.subf %50, %67 : vector<8x8xf32>
    %69 = math.exp %68 : vector<8x8xf32>
    %cst_42 = arith.constant dense<0.000000e+00> : vector<8xf32>
    %70 = vector.multi_reduction <add>, %69, %cst_42 [1] : vector<8x8xf32> to vector<8xf32>
    %71 = vector.shape_cast %70 : vector<8xf32> to vector<8x1xf32>
    %72 = vector.broadcast %63 : vector<8x1xf32> to vector<8x8xf32>
    %73 = arith.subf %56, %72 : vector<8x8xf32>
    %74 = math.exp %73 : vector<8x8xf32>
    %cst_43 = arith.constant dense<0.000000e+00> : vector<8xf32>
    %75 = vector.multi_reduction <add>, %74, %cst_43 [1] : vector<8x8xf32> to vector<8xf32>
    %76 = vector.shape_cast %75 : vector<8xf32> to vector<8x1xf32>
    %77 = arith.addf %71, %76 : vector<8x1xf32>
    %c0_44 = arith.constant 0 : index
    %c0_45 = arith.constant 0 : index
    %78 = vector.load %arg10[%c0_44, %c0_45] : memref<8x1xf32, #tpu.memory_space<vmem>>, vector<8x1xf32>
    %79 = arith.mulf %66, %78 : vector<8x1xf32>
    %80 = arith.addf %79, %77 : vector<8x1xf32>
    %c0_46 = arith.constant 0 : index
    %c0_47 = arith.constant 0 : index
    %81 = vector.load %arg10[%c0_46, %c0_47] : memref<8x1xf32, #tpu.memory_space<vmem>>, vector<8x1xf32>
    tpu.vector_store %arg10[%c0_46, %c0_47], %80 {strides = array<i32>} : memref<8x1xf32, #tpu.memory_space<vmem>>, vector<8x1xf32>,
    %c0_48 = arith.constant 0 : index
    %c0_49 = arith.constant 0 : index
    %82 = vector.load %arg9[%c0_48, %c0_49] : memref<8x1xf32, #tpu.memory_space<vmem>>, vector<8x1xf32>
    tpu.vector_store %arg9[%c0_48, %c0_49], %63 {strides = array<i32>} : memref<8x1xf32, #tpu.memory_space<vmem>>, vector<8x1xf32>,
    %c3_i32 = arith.constant 3 : i32
    %83 = arith.cmpi eq, %arg1, %c3_i32 : i32
    %84 = arith.extui %83 : i1 to i32
    %c0_i32_50 = arith.constant 0 : i32
    %85 = arith.cmpi ne, %84, %c0_i32_50 : i32
    scf.if %85 {
      %c0_51 = arith.constant 0 : index
      %c0_52 = arith.constant 0 : index
      %86 = vector.load %arg7[%c0_51, %c0_52] : memref<8x1xf32, #tpu.memory_space<vmem>>, vector<8x1xf32>
      %c0_53 = arith.constant 0 : index
      %c0_54 = arith.constant 0 : index
      %87 = vector.load %arg8[%c0_53, %c0_54] : memref<8x1xf32, #tpu.memory_space<vmem>>, vector<8x1xf32>
      %88 = math.log %87 : vector<8x1xf32>
      %89 = arith.addf %86, %88 : vector<8x1xf32>
      %c0_55 = arith.constant 0 : index
      %c0_56 = arith.constant 0 : index
      %90 = vector.load %arg9[%c0_55, %c0_56] : memref<8x1xf32, #tpu.memory_space<vmem>>, vector<8x1xf32>
      %c0_57 = arith.constant 0 : index
      %c0_58 = arith.constant 0 : index
      %91 = vector.load %arg10[%c0_57, %c0_58] : memref<8x1xf32, #tpu.memory_space<vmem>>, vector<8x1xf32>
      %92 = math.log %91 : vector<8x1xf32>
      %93 = arith.addf %90, %92 : vector<8x1xf32>
      %94 = arith.addf %89, %93 : vector<8x1xf32>
      %c0_59 = arith.constant 0 : index
      %c0_60 = arith.constant 0 : index
      %95 = vector.load %arg11[%c0_59, %c0_60] : memref<8x1xf32, #tpu.memory_space<vmem>>, vector<8x1xf32>
      %cst_61 = arith.constant 2.000000e+00 : f32
      %96 = vector.broadcast %cst_61 : f32 to vector<8x1xf32>
      %97 = arith.mulf %96, %95 : vector<8x1xf32>
      %98 = arith.subf %94, %97 : vector<8x1xf32>
      %c0_62 = arith.constant 0 : index
      %c0_63 = arith.constant 0 : index
      %99 = vector.load %arg6[%c0_62, %c0_63] : memref<8x1xf32, #tpu.memory_space<vmem>>, vector<8x1xf32>
      tpu.vector_store %arg6[%c0_62, %c0_63], %98 {strides = array<i32>} : memref<8x1xf32, #tpu.memory_space<vmem>>, vector<8x1xf32>,
    } else {
    }
    return
  }
  func.func @transform_0(%arg0: i32, %arg1: i32) -> (i32, i32) {
    %c0_i32 = arith.constant 0 : i32
    %c0_i32_0 = arith.constant 0 : i32
    return %arg0, %c0_i32 : i32, i32
  }
  func.func @transform_1(%arg0: i32, %arg1: i32) -> (i32, i32) {
    %c0_i32 = arith.constant 0 : i32
    %c0_i32_0 = arith.constant 0 : i32
    return %arg0, %c0_i32 : i32, i32
  }
  func.func @transform_2(%arg0: i32, %arg1: i32) -> (i32, i32) {
    %c0_i32 = arith.constant 0 : i32
    %c0_i32_0 = arith.constant 0 : i32
    return %arg1, %c0_i32 : i32, i32
  }
  func.func @transform_3(%arg0: i32, %arg1: i32) -> (i32, i32) {
    %c0_i32 = arith.constant 0 : i32
    %c0_i32_0 = arith.constant 0 : i32
    return %arg1, %c0_i32 : i32, i32
  }
  func.func @transform_4(%arg0: i32, %arg1: i32) -> (i32, i32) {
    %c0_i32 = arith.constant 0 : i32
    %c0_i32_0 = arith.constant 0 : i32
    return %arg0, %c0_i32 : i32, i32
  }
}

</mosaic_0001>

<bundles_post_ra>
// kernel: tpu_custom_call.1
= control target key start
LH: loop header
LB: loop body
LE: loop exit
PB: predicated region body
PF: predicated region fallthrough
CT: control target
= control target key end

     0   :  { %s1704_s0 = inlined_call_operand.hbm [shape: f32[32,128], index: 0, kind: input, shape index: {}]   ;;  %s1705_s1 = inlined_call_operand.hbm [shape: f32[32,128], index: 1, kind: input, shape index: {}]   ;;  %s1706_s2 = inlined_call_operand.hbm [shape: f32[32,128], index: 2, kind: input, shape index: {}]   ;;  %s1707_s3 = inlined_call_operand.hbm [shape: f32[32,128], index: 3, kind: input, shape index: {}]   ;;  %s1708_s4 = inlined_call_operand.vmem [shape: f32[32,1], index: 4, kind: output, shape index: {}]  }
   0x1   :  { %1713 = sst [smem:[#allocation21_spill]] %s1704_s0 }
   0x2   :  { %1714 = sst [smem:[#allocation22_spill]] %s1705_s1 }
   0x3   :  { %1715 = sst [smem:[#allocation23_spill]] %s1706_s2 }
   0x4   :  { %9 = vsyncpa [#allocation8], 0 }
   0x5   :  { %11 = vsyncpa [#allocation8 + $0x1], 0 }
   0x6   :  { %12 = vsyncpa [#allocation10], 0 }
   0x7   :  { %14 = vsyncpa [#allocation10 + $0x1], 0 }
   0x8   :  { %15 = vsyncpa [#allocation13], 0 }
   0x9   :  { %17 = vsyncpa [#allocation13 + $0x1], 0  ;;  %s1399_s15 = smov 0   ;;  %s1401_s16 = smov 0  }
   0xa   :  { %s1403_s17 = smov 0   ;;  %s1405_s18 = smov 0  }
   0xb   :  { %s1407_s19 = smov 0   ;;  %s1409_s20 = smov 0  }
   0xc   :  { %s1411_s21 = smov 0   ;;  %s1413_s22 = smov 0  }
   0xd   :  { %s1415_s23 = smov 0   ;;  %s1417_s24 = smov 0  }
   0xe   :  { %s1419_s25 = smov 0  }
   0xf LB: > { %1716 = sst [smem:[#allocation18_spill]] %s1339_s21  ;;  %s1709_s26 = sadd.s32 4294967295, %s1355_s25   ;;  %s1355_s25 = sphi %s1419_s25, %s23_s25   ;;  %s1351_s24 = sphi %s1417_s24, %s1747_s24   ;;  %s1347_s23 = sphi %s1415_s23, %s1746_s23   ;;  %s1343_s22 = sphi %s1413_s22, %s1745_s22   ;;  %s1339_s21 = sphi %s1411_s21, %s1744_s21   ;;  %s1335_s20 = sphi %s1409_s20, %s1743_s20   ;;  %s1331_s19 = sphi %s1407_s19, %s1742_s19   ;;  %s1327_s18 = sphi %s1405_s18, %s1741_s18   ;;  %s1323_s17 = sphi %s1403_s17, %s1740_s17   ;;  %s1319_s16 = sphi %s1401_s16, %s1739_s16   ;;  %s1315_s15 = sphi %s1399_s15, %s1738_s15  }
  0x10   : > { %p49_p0 = scmp.ne.s32.totalorder %s1335_s20, %s1331_s19  ;;  %p50_p1 = scmp.eq.s32.totalorder %s1355_s25, 0 }
  0x11   : > { %p55_p2 = scmp.ne.s32.totalorder %s1331_s19, %s1327_s18  ;;  %p56_p3 = scmp.eq.s32.totalorder %s1709_s26, 0 }
  0x12   : > { %p101_p4 = scmp.ne.s32.totalorder %s1323_s17, %s1319_s16  ;;  %p51_p5 = por %p50_p1, %p49_p0 }
  0x13   : > { %p107_p6 = scmp.ne.s32.totalorder %s1319_s16, %s1315_s15  ;;  %p1462_p7 = por %p56_p3, %p55_p2 }
  0x14   : > { %p103_p8 = por %p101_p4, %p50_p1  ;;  %p1004_p10 = scmp.lt.s32.totalorder %s1355_s25, 16 }
  0x15   : > { %p1466_p9 = por %p107_p6, %p56_p3  ;;  %s183_s5 = sand.u32 1, %s1335_s20  }
  0x16   : > { %s1474_s6 = sshll.u32 %s183_s5, 3  ;;  %s919_s7 = sshll.u32 %s1351_s24, 7 }
  0x17   : > { %p1477_p11 = pnand %p1004_p10, %p51_p5  ;;  %s201_s9 = sand.u32 1, %s1355_s25  }
  0x18   : > { %s1720_s1 = sld [smem:[#allocation22_spill]]  ;;  %s205_s13 = scalar_lea.vmem [#allocation9], %s1474_s6 }
  0x19   : > { %s212_s14 = sshll.u32 %s205_s13, 4  ;;  %p1486_p12 = pnand %p1004_p10, %p103_p8  ;;  %s213_s14 = int_to_ptr.vmem [resolvable:$true] %s212_s14 }
  0x1a   : > { %p926_p13 = scmp.ge.s32.totalorder %s1355_s25, 1  ;;  %s1491_s18 = scalar_lea.sflag [#allocation10], %s201_s9 }
  0x1b   : > { %p1135_p0 = pneg %p1477_p11  ;;  %s1146_s26 = scalar_lea.vmem %s213_s14, 128 }
  0x1c   : > { %p1147_p1 = scmp.ne.s32.totalorder %s213_s14, %s1146_s26  ;;  %s1365_s10 = smov [#allocation9]  }
  0x1d   : > { %s1151_s11 = sshll.u32 %s1365_s10, 4  ;;  %s1152_s11 = int_to_ptr.vmem [resolvable:$false] %s1151_s11 }
  0x1e   : > { %s210_s12 = scalar_lea.hbm %s1720_s1, %s919_s7  ;;  %p1149_p2 = pnand %p1147_p1, %p1135_p0 }
  0x1f   : > { %s1153_s13 = scalar_lea.vmem %s1152_s11, 256  ;;  %p1154_p4 = scmp.lt.s32.totalorder %s213_s14, %s1152_s11 }
  0x20   : > { %p1150_p3 = pneg %p1149_p2  ;;  %p1155_p5 = scmp.lt.s32.totalorder %s1153_s13, %s1146_s26 }
  0x22   : > { %p1156_p6 = por %p1155_p5, %p1154_p4 }
  0x24   : > { %p1157_p8 = pnand %p1156_p6, %p1150_p3 }
  0x26   : > { %1160 = shalt.err (!%p1157_p8)
}
  0x27   : > { %997 = dma.hbm_to_vmem [thread:$0]  (!%p1477_p11), %s210_s12, 128, %s213_s14, %s1491_s18  }
  0x28   : > { %p253_p10 = scmp.lt.s32.totalorder %s1355_s25, 17  ;;  %s1723_s0 = sld [smem:[#allocation21_spill]] }
  0x29   : > { %s187_s13 = scalar_lea.vmem [#allocation7], %s1474_s6  ;;  %s184_s27 = scalar_lea.sflag [#allocation8], %s183_s5 }
  0x2a   : > { %p1504_p1 = pnand %p926_p13, %p253_p10  ;;  %s194_s28 = sshll.u32 %s187_s13, 4  ;;  %s195_s28 = int_to_ptr.vmem [resolvable:$true] %s194_s28 }
  0x2b   : > { %s1174_s1 = scalar_lea.vmem %s195_s28, 128  ;;  %s1366_s12 = smov [#allocation7]  }
  0x2c   : > { %p1175_p2 = scmp.ne.s32.totalorder %s195_s28, %s1174_s1  ;;  %s1179_s14 = sshll.u32 %s1366_s12, 4  ;;  %s1180_s14 = int_to_ptr.vmem [resolvable:$false] %s1179_s14 }
  0x2d   : > { %s1181_s21 = scalar_lea.vmem %s1180_s14, 256  ;;  %p1182_p13 = scmp.lt.s32.totalorder %s195_s28, %s1180_s14 }
  0x2e   : > { %s192_s11 = scalar_lea.hbm %s1723_s0, %s919_s7  ;;  %p1177_p3 = pnand %p1175_p2, %p1135_p0 }
  0x2f   : > { %p1183_p5 = scmp.lt.s32.totalorder %s1181_s21, %s1174_s1 }
  0x30   : > { %p1178_p4 = pneg %p1177_p3 }
  0x31   : > { %p1184_p6 = por %p1183_p5, %p1182_p13 }
  0x33   : > { %p1185_p8 = pnand %p1184_p6, %p1178_p4 }
  0x35   : > { %1188 = shalt.err (!%p1185_p8)
}
  0x36   : > { %994 = dma.hbm_to_vmem [thread:$0]  (!%p1477_p11), %s192_s11, 128, %s195_s28, %s184_s27  }
  0x37   : > { %s32_s5 = sadd.s32 1, %s1347_s23  ;;  %s94_s6 = sadd.s32 1, %s1323_s17 }
  0x38   : > { %p33_p0 = scmp.ge.s32.totalorder %s32_s5, 4  ;;  %s1710_s1 = sand.u32 1, %s1323_s17  }
  0x39   : > { %s1524_s21 = sshll.u32 %s1710_s1, 3  ;;  %s923_s7 = sshll.u32 %s1347_s23, 7 }
  0x3a   : > { %s1749_s5 = smov (%p33_p0, %s32_s5), 0  ;;  %s1725_s8 = sadd.s32 1, %s1351_s24 }
  0x3b   : > { %1724 = sst [smem:[#allocation19_spill]] %s1749_s5  ;;  %s1751_s8 = smov (!%p33_p0, %s1725_s8), %s1351_s24 }
  0x3c   : > { %s91_s10 = ssub.s32 %s1347_s23, %s1749_s5  ;;  %p37_p11 = scmp.ge.s32.totalorder %s1751_s8, 4 }
  0x3d   : > { %p92_p10 = scmp.eq.s32.totalorder %s91_s10, 0  ;;  %s1726_s2 = sld [smem:[#allocation23_spill]] }
  0x3e   : > { %s223_s11 = scalar_lea.vmem [#allocation11], %s1524_s21  ;;  %s1753_s8 = smov (%p37_p11, %s1751_s8), 0 }
  0x3f   : > { %s230_s13 = sshll.u32 %s223_s11, 4  ;;  %1727 = sst [smem:[#allocation20_spill]] %s1753_s8  ;;  %s231_s13 = int_to_ptr.vmem [resolvable:$true] %s230_s13 }
  0x40   : > { %s1543_s12 = scalar_select %p92_p10, %s1323_s17, %s94_s6  }
  0x41   : > { %s39_s14 = ssub.s32 %s1351_s24, %s1753_s8  ;;  %p1191_p3 = pneg %p1486_p12 }
  0x42   : > { %p1547_p2 = scmp.eq.s32.totalorder %s39_s14, 0  ;;  %s1202_s10 = scalar_lea.vmem %s231_s13, 128 }
  0x43   : > { %s228_s26 = scalar_lea.hbm %s1726_s2, %s923_s7  ;;  %p1203_p4 = scmp.ne.s32.totalorder %s231_s13, %s1202_s10 }
  0x44   : > { %s1367_s27 = smov [#allocation11]  }
  0x45   : > { %p1205_p13 = pnand %p1203_p4, %p1191_p3  ;;  %s1207_s28 = sshll.u32 %s1367_s27, 4  ;;  %s1208_s28 = int_to_ptr.vmem [resolvable:$false] %s1207_s28 }
  0x46   : > { %s1209_s11 = scalar_lea.vmem %s1208_s28, 256  ;;  %p1210_p6 = scmp.lt.s32.totalorder %s231_s13, %s1208_s28 }
  0x47   : > { %p1206_p5 = pneg %p1205_p13  ;;  %p1211_p8 = scmp.lt.s32.totalorder %s1209_s11, %s1202_s10 }
  0x49   : > { %p1212_p0 = por %p1211_p8, %p1210_p6 }
  0x4b   : > { %p1213_p11 = pnand %p1212_p0, %p1206_p5 }
  0x4d   : > { %1216 = shalt.err (!%p1213_p11)
}
  0x4e   : > { %1000 = dma.hbm_to_vmem [thread:$0]  (!%p1486_p12), %s228_s26, 128, %s231_s13, %s1491_s18  }
  0x4f   : > { %s1729_s6 = sadd.s32 1, %s1335_s20  ;;  %s246_s28 = scalar_lea.hbm %s1707_s3, %s923_s7 }
  0x50   : > { %s1564_s14 = scalar_select %p1547_p2, %s1335_s20, %s1729_s6  }
  0x51   : > { %s241_s11 = scalar_lea.vmem [#allocation12], %s1524_s21  ;;  %s1730_s2 = sand.u32 1, %s1323_s17  }
  0x52   : > { %s248_s0 = sshll.u32 %s241_s11, 4  ;;  %s238_s8 = scalar_lea.sflag [#allocation13], %s1730_s2  ;;  %s249_s0 = int_to_ptr.vmem [resolvable:$true] %s248_s0 }
  0x53   : > { %s1230_s5 = scalar_lea.vmem %s249_s0, 128  ;;  %s1368_s18 = smov [#allocation12]  }
  0x54   : > { %p1231_p10 = scmp.ne.s32.totalorder %s249_s0, %s1230_s5  ;;  %s1235_s1 = sshll.u32 %s1368_s18, 4  ;;  %s1236_s1 = int_to_ptr.vmem [resolvable:$false] %s1235_s1 }
  0x55   : > { %s1237_s26 = scalar_lea.vmem %s1236_s1, 256  ;;  %p1238_p2 = scmp.lt.s32.totalorder %s249_s0, %s1236_s1 }
  0x56   : > { %p1233_p4 = pnand %p1231_p10, %p1191_p3  ;;  %p1239_p5 = scmp.lt.s32.totalorder %s1237_s26, %s1230_s5 }
  0x58   : > { %p1234_p13 = pneg %p1233_p4  ;;  %p1240_p6 = por %p1239_p5, %p1238_p2 }
  0x5a   : > { %p1241_p8 = pnand %p1240_p6, %p1234_p13 }
  0x5c   : > { %1244 = shalt.err (!%p1241_p8)
}
  0x5d   : > { %1003 = dma.hbm_to_vmem [thread:$0]  (!%p1486_p12), %s246_s28, 128, %s249_s0, %s238_s8  }
  0x5e   : > { %257 = sbr.rel (%p1504_p1) target bundleno = 1139 (0x473), region = 36  ;;  %s259_s2 = sand.u32 (!%p1504_p1), 1, %s1331_s19  }
  0x5f   : > { %s1582_s21 = sshll.u32 (!%p1504_p1), %s259_s2, 3  ;;  %s260_s7 = scalar_lea.sflag (!%p1504_p1), [#allocation8], %s259_s2 }
  0x60   : > { %s263_s13 = scalar_lea.vmem (!%p1504_p1), [#allocation7], %s1582_s21 }
  0x63   : > { %1298 = dma.done.wait (%p1462_p7), %s260_s7, 128  }
  0x64   : > { %1300 = vsyncadd (%p1462_p7), %s260_s7, 4294967168  ;;  %s1731_s5 = sadd.s32 4294967295, %s1355_s25   ;;  %s272_s9 = scalar_lea.vmem [#allocation9], %s1582_s21 }
  0x65   : > { %s268_s0 = sand.u32 1, %s1731_s5  }
  0x66   : > { %s269_s15 = scalar_lea.sflag [#allocation10], %s268_s0 }
  0x67   : > { %1302 = dma.done.wait (%p1462_p7), %s269_s15, 128  }
  0x68   : > { %1304 = vsyncadd (%p1462_p7), %s269_s15, 4294967168  ;;  %s279_s8 = sand.u32 1, %s1319_s16  }
  0x69   : > { %s929_s6 = sshll.u32 %s279_s8, 3 }
  0x6a   : > { %s281_s10 = scalar_lea.vmem [#allocation11], %s929_s6 }
  0x6b   : > { %1306 = dma.done.wait (%p1466_p9), %s269_s15, 128  }
  0x6c   : > { %1308 = vsyncadd (%p1466_p9), %s269_s15, 4294967168  ;;  %s287_s27 = scalar_lea.sflag [#allocation13], %s279_s8  ;;  %s290_s28 = scalar_lea.vmem [#allocation12], %s929_s6 }
  0x6d   : > { %1310 = dma.done.wait (%p1466_p9), %s287_s27, 128  }
  0x6e   : > { %1312 = vsyncadd (%p1466_p9), %s287_s27, 4294967168  ;;  %p329_p7 = scmp.lt.s32.totalorder %s1343_s22, 3  ;;  %s1732_s2 = sld [smem:[#allocation18_spill]] }
  0x70   : > { %s330_s29 = scalar_select %p329_p7, %s1343_s22, 3 }
  0x72   : > { %s931_s11 = sshll.u32 %s330_s29, 3 }
  0x73   : > { %s1610_s26 = scalar_lea.vmem %s1708_s4, %s931_s11 }
  0x74   : > { %p932_p12 = scmp.ne.s32.totalorder %s1732_s2, 0 }
  0x76   : > { %336 = sbr.rel (%p932_p12) target bundleno = 127 (0x7f), region = 56 }
  0x7b   : > { %vm337_vm0 = vcmask 7168   ;;  %v1369_v0 = vmov -inf   ;;  %v1370_v1 = vmov 0.0  }
  0x7c   : > { %338 = vst.msk [vmem:[#allocation2] sm:$0xff] %vm337_vm0, %v1369_v0  ;;  %340 = vst.msk [vmem:[#allocation4] sm:$0xff] %vm337_vm0, %v1369_v0 }
  0x7d   : > { %339 = vst.msk [vmem:[#allocation3] sm:$0xff] %vm337_vm0, %v1370_v1  ;;  %341 = vst.msk [vmem:[#allocation5] sm:$0xff] %vm337_vm0, %v1370_v1 }
  0x7e   : > { %342 = vst.msk [vmem:[#allocation6] sm:$0xff] %vm337_vm0, %v1370_v1 }
  0x7f PF: > { %v344_v2 = vld [vmem:[%s272_s9] sm:$0xff]  ;;  %s1733_s30 = sld [smem:[#allocation18_spill]]  ;;  %s1614_s7 = sshll.u32 %s1343_s22, 3  ;;  %v345_v4 = vld [vmem:[%s281_s10] sm:$0xff]  ;;  %v1371_v5 = vmov 0.0   ;;  %vm1372_vm1 = vmmov 0  }
  0x80   : > { %v346_v3 = vld [vmem:[%s290_s28] sm:$0xff]  ;;  %s351_s15 = sadd.s32 8, %s1614_s7  ;;  %946 = vmatprep.subr.mxu0 %v1371_v5  ;;  %951 = vmatprep.subr.mxu1 %v1371_v5  ;;  %v343_v6 = vld [vmem:[%s263_s13] sm:$0xff]  ;;  %v1357_v12 = vmov 0   ;;  %v1361_v13 = vmov 0  }
  0x81   : > { %947 = vmatpush3.xpose.msra.mxu0 %v346_v3  ;;  %952 = vmatpush3.xpose.msra.mxu1 %v345_v4 }
  0x82   : > { %948 = vmatprep.mubr.msk.f32.mxu0 %vm1372_vm1, %v1371_v5  ;;  %953 = vmatprep.mubr.msk.f32.mxu1 %vm1372_vm1, %v1371_v5 }
  0x84   : > { %949 = vmatmul.mubr.f32.vlgmr.msra.gmra.mxu0 %v343_v6  ;;  %954 = vmatmul.mubr.f32.vlgmr.msra.gmra.mxu1 %v343_v6 }
  0x85   : > { %s1617_s5 = sshll.u32 %s1733_s30, 3 }
  0x86   : > { %s349_s0 = sadd.s32 8, %s1617_s5  ;;  %p352_p1 = scmp.lt.s32.totalorder %s1617_s5, %s351_s15 }
  0x87   : > { %p350_p9 = scmp.lt.s32.totalorder %s1614_s7, %s349_s0 }
  0x89   : > { %p1627_p3 = pnand %p352_p1, %p350_p9 }
 0x142   : > { %497 = sbr.rel (%p1627_p3) target bundleno = 474 (0x1da), region = 60 }
 0x144   : > { %v1631_v7 = vpop.f32.mrf.mxu0  ;;  %v491_v8 = vpop.f32.mrf.mxu1 }
 0x145   : > { %v495_v9 = vmul.f32 0.8, %v491_v8 }
 0x146   : > { %v950_v10 = vpop.f32.mrf.mxu0  ;;  %v955_v11 = vpop.f32.mrf.mxu1 }
 0x147   : > { %v498_v14 = vlaneseq  ;;  %v500_v15 = vstv %s1614_s7  ;;  %v504_v16 = vstv %s1617_s5  ;;  %vm508_vm2 = vcmask 64512  }
 0x149   : > { %v499_v17 = vshrl.u32 %v498_v14, 7  ;;  %v503_v18 = vand.u32 127, %v498_v14 }
 0x14b   : > { %v501_v19 = vadd.s32 %v500_v15, %v499_v17  ;;  %v505_v20 = vadd.s32 %v504_v16, %v503_v18 }
 0x14d   : > { %vm506_vm3 = vcmp.eq.s32.totalorder %v501_v19, %v505_v20 }
 0x14e   : > { %v507_v21 = vsel %vm506_vm3, %v1631_v7, 0.0  ;;  %v512_v13 = vsel %vm506_vm3, 0.0, %v495_v9  }
 0x14f   : > { %v509_v22 = vsel %vm508_vm2, %v507_v21, 0.0 }
 0x150   : > { %510 = vadd.xlane.f32.xlu0 %v509_v22 }
 0x1d9   : > { %v511_v12 = vpop.xlane.xlu0 %510  }
 0x1da PF: > { %956 = vmatprep.subr.mxu0 %v1371_v5  ;;  %961 = vmatprep.subr.mxu1 %v1371_v5  ;;  %vm524_vm4 = vcmask 64512   ;;  %s974_s21 = scalar_select %p1627_p3, 1, 0  ;;  %v520_v25 = vld [vmem:[#allocation6] sm:$0xff]  ;;  %vm522_vm6 = vcmask 7168   ;;  %v1373_v30 = vmov 0   ;;  %v703_v37 = vlaneseq  ;;  %v1363_v13 = vphi %v1361_v13, %v512_v13   ;;  %v1359_v12 = vphi %v1357_v12, %v511_v12  }
 0x1db   : > { %957 = vmatpush3.xpose.msra.mxu0 %v345_v4  ;;  %962 = vmatpush3.xpose.msra.mxu1 %v346_v3  ;;  %v525_v23 = vsel %vm524_vm4, %v1631_v7, -inf  ;;  %v1648_v32 = vld [vmem:[#allocation2] sm:$0xff]  ;;  %v705_v40 = vstv %s1614_s7  ;;  %v709_v41 = vstv %s1617_s5  ;;  %s1005_s13 = scalar_select %p1627_p3, 0, 1  ;;  %v725_v61 = vld [vmem:[#allocation4] sm:$0xff]  ;;  %v555_v18 = vld [vmem:[#allocation3] sm:$0xff] }
 0x1dc   : > { %958 = vmatprep.mubr.msk.f32.mxu0 %vm1372_vm1, %v1371_v5  ;;  %963 = vmatprep.mubr.msk.f32.mxu1 %vm1372_vm1, %v1371_v5  ;;  %v975_v24 = vstv %s974_s21  ;;  %v704_v38 = vshrl.u32 %v703_v37, 7  ;;  %v708_v39 = vand.u32 127, %v703_v37  ;;  %s1735_s9 = sld [smem:[#allocation18_spill]] }
 0x1dd   : > { %526 = vmax.xlane.f32.xlu0 %v525_v23  ;;  %vm976_vm5 = vcmp.ne.s32.totalorder %v975_v24, 0  ;;  %1116 = vset.pattern.permute.xlu1 %v1373_v30  ;;  %v984_v44 = vstv %s1005_s13 }
 0x1de   : > { %959 = vmatmul.mubr.f32.vlgmr.msra.gmra.mxu0 %v344_v2  ;;  %964 = vmatmul.mubr.f32.vlgmr.msra.gmra.mxu1 %v344_v2  ;;  %v977_v26 = vsel %vm976_vm5, %v495_v9, %v1363_v13  ;;  %v981_v27 = vsel %vm976_vm5, 0.0, %v1359_v12  ;;  %v706_v42 = vadd.s32 %v705_v40, %v704_v38  ;;  %v710_v43 = vadd.s32 %v709_v41, %v708_v39 }
 0x1df   : > { %v521_v28 = vadd.f32 %v981_v27, %v520_v25  ;;  %v528_v29 = vsel %vm524_vm4, %v977_v26, -inf  ;;  %1115 = vset.pattern.permute.xlu0 %v1373_v30  ;;  %vm985_vm8 = vcmp.ne.s32.totalorder %v984_v44, 0 }
 0x1e0   : > { %vm711_vm7 = vcmp.eq.s32.totalorder %v706_v42, %v710_v43 }
 0x1e1   : > { %523 = vst.msk [vmem:[#allocation6] sm:$0xff] %vm522_vm6, %v521_v28  ;;  %529 = vmax.xlane.f32.xlu0 %v528_v29 }
 0x1e2   : > { %p935_p0 = scmp.ne.s32.totalorder %s1735_s9, 3 }
 0x266   : > { %v527_v31 = vpop.xlane.xlu0 %526 }
 0x26a   : > { %v530_v33 = vpop.xlane.xlu0 %529 }
 0x26b   : > { %v531_v34 = vmax.f32 %v527_v31, %v530_v33 }
 0x26d   : > { %v533_v35 = vmax.f32 %v1648_v32, %v531_v34 }
 0x26f   : > { %v534_v36 = vsub.f32 %v1648_v32, %v533_v35  ;;  %559 = vst.msk [vmem:[#allocation2] sm:$0xff] %vm522_vm6, %v533_v35  ;;  %539 = vperm.xlu0 %1115, %v533_v35  }
 0x271   : > { %v535_v15 = vmul.f32 1.442695, %v534_v36 }
 0x29e   : > { %v626_v45 = vpop.f32.mrf.mxu0  ;;  %v696_v46 = vpop.f32.mrf.mxu1 }
 0x29f   : > { %v700_v47 = vmul.f32 0.8, %v696_v46  ;;  %v718_v48 = vsel %vm524_vm4, %v626_v45, -inf }
 0x2a0   : > { %v960_v49 = vpop.f32.mrf.mxu0  ;;  %v965_v50 = vpop.f32.mrf.mxu1  ;;  %719 = vmax.xlane.f32.xlu1 %v718_v48 }
 0x2a1   : > { %v712_v51 = vsel %vm711_vm7, 0.0, %v700_v47 }
 0x2a2   : > { %v986_v52 = vsel %vm985_vm8, %v712_v51, 0 }
 0x2a3   : > { %v990_v53 = vsel %vm976_vm5, %v700_v47, %v986_v52 }
 0x2a4   : > { %v721_v54 = vsel %vm524_vm4, %v990_v53, -inf }
 0x2a5   : > { %722 = vmax.xlane.f32.xlu1 %v721_v54 }
 0x2ea   : > { %v540_v55 = vpop.permute.xlu0 %539 }
 0x2eb   : > { %v548_v56 = vsub.f32 %v977_v26, %v540_v55  ;;  %v542_v2 = vsub.f32 %v1631_v7, %v540_v55  ;;  %v748_v26 = vld [vmem:[#allocation5] sm:$0xff] }
 0x2ed   : > { %v549_v57 = vmul.f32 1.442695, %v548_v56  ;;  %v543_v3 = vmul.f32 1.442695, %v542_v2 }
 0x2ef   : > { %1117 = vpow2.f32 %v549_v57 }
 0x2f0   : > { %1119 = vpow2.f32 %v543_v3 }
 0x2fc   : > { %v1118_v58 = vpop.eup %1117 }
 0x2fd   : > { %v551_v59 = vsel %vm524_vm4, %v1118_v58, 0.0  ;;  %v1120_v4 = vpop.eup %1119 }
 0x2fe   : > { %552 = vadd.xlane.f32.xlu0 %v551_v59  ;;  %v545_v5 = vsel %vm524_vm4, %v1120_v4, 0.0 }
 0x329   : > { %v720_v60 = vpop.xlane.xlu1 %719 }
 0x32e   : > { %v723_v62 = vpop.xlane.xlu1 %722 }
 0x32f   : > { %v724_v63 = vmax.f32 %v720_v60, %v723_v62 }
 0x331   : > { %v726_v0 = vmax.f32 %v725_v61, %v724_v63 }
 0x333   : > { %v727_v1 = vsub.f32 %v725_v61, %v726_v0  ;;  %752 = vst.msk [vmem:[#allocation4] sm:$0xff] %vm522_vm6, %v726_v0  ;;  %732 = vperm.xlu1 %1116, %v726_v0  }
 0x335   : > { %v728_v23 = vmul.f32 1.442695, %v727_v1 }
 0x357   : > { %546 = vadd.xlane.f32.xlu1 %v545_v5 }
 0x387   : > { %v553_v17 = vpop.xlane.xlu0 %552 }
 0x3ae   : > { %v733_v6 = vpop.permute.xlu1 %732 }
 0x3af   : > { %v735_v8 = vsub.f32 %v626_v45, %v733_v6  ;;  %v741_v9 = vsub.f32 %v990_v53, %v733_v6 }
 0x3b1   : > { %v736_v10 = vmul.f32 1.442695, %v735_v8  ;;  %v742_v11 = vmul.f32 1.442695, %v741_v9 }
 0x3b3   : > { %1121 = vpow2.f32 %v736_v10 }
 0x3b4   : > { %1123 = vpow2.f32 %v742_v11 }
 0x3b5   : > { %1125 = vpow2.f32 %v535_v15 }
 0x3b6   : > { %1127 = vpow2.f32 %v728_v23 }
 0x3c0   : > { %v1122_v12 = vpop.eup %1121 }
 0x3c1   : > { %v738_v13 = vsel %vm524_vm4, %v1122_v12, 0.0  ;;  %v1124_v14 = vpop.eup %1123 }
 0x3c2   : > { %739 = vadd.xlane.f32.xlu1 %v738_v13  ;;  %v744_v7 = vsel %vm524_vm4, %v1124_v14, 0.0  ;;  %v1126_v16 = vpop.eup %1125 }
 0x3c3   : > { %v556_v21 = vmul.f32 %v1126_v16, %v555_v18  ;;  %v1128_v25 = vpop.eup %1127 }
 0x3c4   : > { %v749_v28 = vmul.f32 %v1128_v25, %v748_v26 }
 0x3c6   : > { %745 = vadd.xlane.f32.xlu1 %v744_v7 }
 0x3e0   : > { %v547_v19 = vpop.xlane.xlu1 %546 }
 0x3e1   : > { %v554_v20 = vadd.f32 %v553_v17, %v547_v19 }
 0x3e3   : > { %v557_v22 = vadd.f32 %v556_v21, %v554_v20 }
 0x3e5   : > { %558 = vst.msk [vmem:[#allocation3] sm:$0xff] %vm522_vm6, %v557_v22 }
 0x44b   : > { %v740_v24 = vpop.xlane.xlu1 %739 }
 0x44f   : > { %v746_v27 = vpop.xlane.xlu1 %745 }
 0x450   : > { %v747_v29 = vadd.f32 %v746_v27, %v740_v24  ;;  %756 = sbr.rel (%p935_p0) target bundleno = 1139 (0x473), region = 76 }
 0x452   : > { %v750_v30 = vadd.f32 %v749_v28, %v747_v29 }
 0x454   : > { %751 = vst.msk [vmem:[#allocation5] sm:$0xff] %vm522_vm6, %v750_v30 }
 0x455   : > { %v758_v31 = vld [vmem:[#allocation3] sm:$0xff]  ;;  %v757_v34 = vld [vmem:[#allocation2] sm:$0xff]  ;;  %v762_v37 = vld [vmem:[#allocation4] sm:$0xff] }
 0x456   : > { %1129 = vlog2.f32 %v758_v31  ;;  %v768_v38 = vld [vmem:[#allocation6] sm:$0xff] }
 0x457   : > { %v769_v42 = vmul.f32 2.0, %v768_v38 }
 0x45b   : > { %v763_v32 = vld [vmem:[#allocation5] sm:$0xff] }
 0x45c   : > { %1131 = vlog2.f32 %v763_v32 }
 0x463   : > { %v1130_v33 = vpop.eup %1129 }
 0x464   : > { %v760_v36 = vmul.f32 0.6931472, %v1130_v33 }
 0x466   : > { %v761_v40 = vadd.f32 %v760_v36, %v757_v34 }
 0x469   : > { %v1132_v35 = vpop.eup %1131 }
 0x46a   : > { %v765_v39 = vmul.f32 0.6931472, %v1132_v35 }
 0x46c   : > { %v766_v41 = vadd.f32 %v765_v39, %v762_v37 }
 0x46e   : > { %v767_v43 = vadd.f32 %v766_v41, %v761_v40 }
 0x470   : > { %v770_v44 = vsub.f32 %v767_v43, %v769_v42 }
 0x472   : > { %771 = vst.msk [vmem:[%s1610_s26] sm:$0xff] %vm522_vm6, %v770_v44 }
 0x473 PF: > { %s23_s25 = sadd.s32 1, %s1355_s25   ;;  %s1736_s8 = sld [smem:[#allocation19_spill]] }
 0x474   : > { %p20_p11 = scmp.ge.s32.totalorder %s23_s25, 18   ;;  %s1737_s6 = sld [smem:[#allocation20_spill]] }
 0x475   : > { %s1738_s15 = smov %s1319_s16  ;;  %s1739_s16 = smov %s1323_s17 }
 0x476   : > { %s1740_s17 = smov %s1543_s12  ;;  %s1741_s18 = smov %s1331_s19 }
 0x477   : > { %s1742_s19 = smov %s1335_s20  ;;  %s1743_s20 = smov %s1564_s14 }
 0x478   : > { %s1744_s21 = smov %s1347_s23  ;;  %s1745_s22 = smov %s1351_s24 }
 0x479   : > { %s1746_s23 = smov %s1736_s8  ;;  %22 = sbr.rel (!%p20_p11) target bundleno = 15 (0xf), region = 137 }
 0x47a   : > { %s1747_s24 = smov %s1737_s6 }
 0x47e   :  { %791 = vsyncpa [#allocation8], 1 }
 0x47f   :  { %793 = vsyncpa [#allocation8 + $0x1], 1 }
 0x480   :  { %794 = vsyncpa [#allocation10], 1 }
 0x481   :  { %796 = vsyncpa [#allocation10 + $0x1], 1 }
 0x482   :  { %797 = vsyncpa [#allocation13], 1 }
 0x483   :  { %799 = vsyncpa [#allocation13 + $0x1], 1 }

</bundles_post_ra>
